<compile_context>
chip_gen: v7x
topology: tpu7x:2x2x1
jax: 0.10.0
libtpu: 0.0.40
codegen_flags: <defaults>
</compile_context>

<pallas_src>
import math

import jax
import jax.numpy as jnp
from jax import lax
from jax.experimental import pallas as pl
from jax.experimental.pallas import tpu as pltpu


# ---------------- BasicBlock hyper-parameters (module __init__ args) ----------------
IN_CHANNELS = 4
OUT_CHANNELS = 8
KERNEL_SIZE = 3
STRIDE = 2                 # downsample=True -> conv1 stride = STRIDE
GROUPS = 1                 # TODO(synk): grouped conv (groups > 1) not implemented
DOWNSAMPLE = True
USE_BN = True              # BatchNorm1d in eval mode (running stats folded to scale/shift)
USE_DO = False             # TODO(synk): training-mode dropout (p=0.5) not implemented
IS_FIRST_BLOCK = False
BN_EPS = 1e-5

BATCH = 2
LENGTH = 16


def same_pad(in_dim, kernel_size, stride):
    """Exactly MyConv1dPadSame / MyMaxPool1dPadSame padding arithmetic."""
    out_dim = (in_dim + stride - 1) // stride
    p = max(0, (out_dim - 1) * stride + kernel_size - in_dim)
    return out_dim, p // 2, p - p // 2


# conv1: SAME pad at stride=STRIDE; conv2: SAME pad at stride=1; maxpool pad (stride=1 calc)
L1, PAD1_L, PAD1_R = same_pad(LENGTH, KERNEL_SIZE, STRIDE)
_L2, PAD2_L, PAD2_R = same_pad(L1, KERNEL_SIZE, 1)
_LM, PADM_L, PADM_R = same_pad(LENGTH, STRIDE, 1)

# The fused kernel is specialized to this geometry; guard the specialization.
assert _L2 == L1 and LENGTH == STRIDE * L1
assert STRIDE == 2 and KERNEL_SIZE == 3
assert (PAD1_L, PAD1_R) == (0, 1) and (PAD2_L, PAD2_R) == (1, 1)
assert (PADM_L, PADM_R) == (0, 1)
assert GROUPS == 1 and USE_BN and (not USE_DO) and (not IS_FIRST_BLOCK) and DOWNSAMPLE

# channel zero-pad split for the residual branch
CH1 = (OUT_CHANNELS - IN_CHANNELS) // 2
CH2 = OUT_CHANNELS - IN_CHANNELS - CH1

NL1 = BATCH * L1                     # fused lane width of the output (2 * 8 = 16)
KCIN = KERNEL_SIZE * IN_CHANNELS     # 12: pre-stacked conv1 tap rows
KCOUT = KERNEL_SIZE * OUT_CHANNELS   # 24: stacked conv2 weight rows
AUX_ROWS = max(KCIN, OUT_CHANNELS)   # packed per-channel aux rows


def basic_block_kernel(x_ref, w1_ref, w2_ref, shift_ref, aux_ref, out_ref):
    # x_ref: (K*C_in, N*L1) pre-stacked raw-x conv1 tap planes (lane idx = n*L1 + j):
    #   rows [0, C_in)      -> x columns 2j     (tap k=0, even parity)
    #   rows [C_in, 2C_in)  -> x columns 2j+1   (tap k=1, odd parity)
    #   rows [2C_in, 3C_in) -> x columns 2j+2   (tap k=2; per-sample last column is the
    #                                            raw zero SAME-pad column)
    x_raw = x_ref[...]                                               # (KCIN, NL1)

    # packed per-channel params (one DMA): cols = [s1 tiled, t1 tiled, t2(+s2*b1), b2]
    s1 = aux_ref[0:KCIN, 0:1]
    t1 = aux_ref[0:KCIN, 1:2]
    t2 = aux_ref[0:OUT_CHANNELS, 2:3]
    b2 = aux_ref[0:OUT_CHANNELS, 3:4]

    # ---------------- main branch: bn1 -> relu1 -> conv1 -> bn2 -> relu2 -> conv2 ----
    # Eval-mode bn1 (scale/shift) + relu1 applied to all three tap planes at once.
    a = jnp.maximum(x_raw * s1 + t1, 0.0)

    # The PyTorch module pads AFTER bn+relu, so the SAME-pad column feeding conv1 must
    # be a literal zero (not relu(t1)): zero each sample's last column of the k=2 plane.
    row = lax.broadcasted_iota(jnp.int32, (KCIN, NL1), 0)
    col = lax.broadcasted_iota(jnp.int32, (KCIN, NL1), 1)
    keep = jnp.logical_or(row < 2 * IN_CHANNELS, (col % L1) != (L1 - 1))
    a = jnp.where(keep, a, 0.0)

    # conv1 (stride 2, K=3, SAME pad (0,1)) as ONE im2col matmul; bn2 scale is already
    # folded into w1 in the wrapper, and conv1's bias into t2.
    acc1 = jnp.dot(w1_ref[...], a, preferred_element_type=jnp.float32)   # (C_out, NL1)

    # bn2 shift + relu2
    h = jnp.maximum(acc1 + t2, 0.0)

    # conv2 (stride 1, K=3, SAME pad (1,1)): one stacked matmul computes all three tap
    # contributions; the per-sample +/-1 column shifts (with zeroed sample boundaries)
    # are applied as tiny constant-matrix matmuls on the idle MXU -> no in-kernel lane
    # concat / roll and no extra masks.
    c = jnp.dot(w2_ref[...], h, preferred_element_type=jnp.float32)      # (KCOUT, NL1)
    c0 = c[0 * OUT_CHANNELS:1 * OUT_CHANNELS, :]   # tap k=0 -> needs shift right
    c1 = c[1 * OUT_CHANNELS:2 * OUT_CHANNELS, :]   # tap k=1 -> unshifted
    c2 = c[2 * OUT_CHANNELS:3 * OUT_CHANNELS, :]   # tap k=2 -> needs shift left
    out = (jnp.dot(c0, shift_ref[0], preferred_element_type=jnp.float32)
           + c1
           + jnp.dot(c2, shift_ref[1], preferred_element_type=jnp.float32)
           + b2)

    # ---------------- identity branch, folded into the single store ------------------
    # SAME-pad max-pool(kernel=STRIDE=2): windows are exactly (even, odd) raw-x pairs,
    # and the right pad column never enters a window.
    x_even = x_ref[0 * IN_CHANNELS:1 * IN_CHANNELS, :]
    x_odd = x_ref[1 * IN_CHANNELS:2 * IN_CHANNELS, :]
    ident = jnp.maximum(x_even, x_odd)                                   # (C_in, NL1)

    # channel zero-pad (rows CH1 : CH1+C_in) + residual add, then ONE lane-dense store.
    pieces = []
    if CH1 > 0:
        pieces.append(jnp.zeros((CH1, NL1), jnp.float32))
    pieces.append(ident)
    if CH2 > 0:
        pieces.append(jnp.zeros((CH2, NL1), jnp.float32))
    ident_padded = jnp.concatenate(pieces, axis=0) if len(pieces) > 1 else ident

    out_ref[...] = (out + ident_padded).astype(out_ref.dtype)


def basic_block_forward(x, params):
    (w1, b1, g1, bt1, rm1, rv1, w2, b2, g2, bt2, rm2, rv2) = params
    n = x.shape[0]
    assert (n, x.shape[1], x.shape[2]) == (BATCH, IN_CHANNELS, LENGTH)
    f32 = jnp.float32

    # Fold eval-mode BatchNorm into per-channel scale/shift; fold conv1's bias into the
    # bn2 shift (bn2(conv1 + b1) = s2*conv1 + (s2*b1 + t2)); fold the bn2 SCALE into the
    # conv1 weights (relu commutes with a per-channel positive-free affine? no — it only
    # commutes because scale applies before the relu's input either way: relu(s2*y + t2)
    # with s2 folded into y's weights is exact).
    s1 = g1 / jnp.sqrt(rv1 + BN_EPS)
    t1 = bt1 - rm1 * s1
    s2 = g2 / jnp.sqrt(rv2 + BN_EPS)
    t2 = (bt2 - rm2 * s2) + s2 * b1

    # conv1 im2col weights (column = k*C_in + c), with s2 folded per output row.
    w1_mat = jnp.transpose(w1, (0, 2, 1)).reshape(OUT_CHANNELS, KCIN)
    w1_mat = (w1_mat * s2[:, None]).astype(f32)

    # conv2 weights stacked along sublanes: row k*C_out + o holds w2[o, :, k].
    w2_stack = jnp.transpose(w2, (2, 0, 1)).reshape(KCOUT, OUT_CHANNELS).astype(f32)

    # Per-sample column-shift matrices (sample boundaries / SAME-pad columns are zero):
    #   (h @ S_r)[:, j] = h[:, j-1] if j % L1 != 0      else 0
    #   (h @ S_l)[:, j] = h[:, j+1] if j % L1 != L1 - 1 else 0
    ii = jnp.arange(NL1)[:, None]
    jj = jnp.arange(NL1)[None, :]
    s_right = ((ii == jj - 1) & ((jj % L1) != 0)).astype(f32)
    s_left = ((ii == jj + 1) & ((jj % L1) != (L1 - 1))).astype(f32)
    shift = jnp.stack([s_right, s_left], axis=0)                     # (2, NL1, NL1)

    # Layout plumbing (wrapper side): deinterleave the stride-2 parities, build the
    # shifted k=2 tap plane (with its raw zero pad column), fuse the batch into lanes
    # and pre-stack the three planes -> (K*C_in, N*L1). No strided reads in the kernel.
    xf = x.astype(f32)
    x_even = xf[:, :, 0::2]                                           # (N, C_in, L1)
    x_odd = xf[:, :, 1::2]                                            # (N, C_in, L1)
    x_next = jnp.pad(xf[:, :, 2::2], ((0, 0), (0, 0), (0, 1)))        # (N, C_in, L1)

    def fuse(p):  # (N, C_in, L1) -> (C_in, N*L1)
        return jnp.transpose(p, (1, 0, 2)).reshape(IN_CHANNELS, NL1)

    x_stk = jnp.concatenate([fuse(x_even), fuse(x_odd), fuse(x_next)], axis=0)

    # One packed aux input: cols = [s1 tiled over taps, t1 tiled, t2(+s2*b1), b2].
    def pad_rows(v):
        return jnp.pad(v, (0, AUX_ROWS - v.shape[0]))

    aux = jnp.stack([pad_rows(jnp.tile(s1, KERNEL_SIZE)),
                     pad_rows(jnp.tile(t1, KERNEL_SIZE)),
                     pad_rows(t2),
                     pad_rows(b2)], axis=1).astype(f32)               # (AUX_ROWS, 4)

    grid_spec = pltpu.PrefetchScalarGridSpec(
        num_scalar_prefetch=0,
        grid=(1,),   # whole batch in one step: grid / DMA overhead paid exactly once
        in_specs=[
            pl.BlockSpec((KCIN, NL1), lambda i: (0, 0)),               # stacked taps
            pl.BlockSpec((OUT_CHANNELS, KCIN), lambda i: (0, 0)),      # conv1 weights (s2 folded)
            pl.BlockSpec((KCOUT, OUT_CHANNELS), lambda i: (0, 0)),     # conv2 stacked weights
            pl.BlockSpec((2, NL1, NL1), lambda i: (0, 0, 0)),          # shift matrices
            pl.BlockSpec((AUX_ROWS, 4), lambda i: (0, 0)),             # packed per-channel aux
        ],
        out_specs=pl.BlockSpec((OUT_CHANNELS, NL1), lambda i: (0, 0)),
        # No VMEM scratch: every intermediate lives in vregs.
    )

    out2d = pl.pallas_call(
        basic_block_kernel,
        out_shape=jax.ShapeDtypeStruct((OUT_CHANNELS, NL1), jnp.float32),
        grid_spec=grid_spec,
        # Single-step grid; if a large batch is tiled over this axis, mark it "parallel"
        # so v7x's two TensorCores split it.
        compiler_params=pltpu.CompilerParams(dimension_semantics=("arbitrary",)),
    )(x_stk, w1_mat, w2_stack, shift, aux)

    # back to PyTorch's (N, C_out, L_out)
    return jnp.transpose(out2d.reshape(OUT_CHANNELS, n, L1), (1, 0, 2))


def reference_forward(x, params):
    """Pure-JAX reference mirroring the PyTorch forward (eval mode)."""
    (w1, b1, g1, bt1, rm1, rv1, w2, b2, g2, bt2, rm2, rv2) = params
    bcast = lambda v: v[None, :, None]
    out = x
    if not IS_FIRST_BLOCK:
        if USE_BN:
            out = (out - bcast(rm1)) / jnp.sqrt(bcast(rv1) + BN_EPS) * bcast(g1) + bcast(bt1)
        out = jnp.maximum(out, 0.0)
    out = jnp.pad(out, ((0, 0), (0, 0), (PAD1_L, PAD1_R)))
    out = lax.conv_general_dilated(out, w1, window_strides=(STRIDE,), padding='VALID',
                                   dimension_numbers=('NCH', 'OIH', 'NCH')) + bcast(b1)
    if USE_BN:
        out = (out - bcast(rm2)) / jnp.sqrt(bcast(rv2) + BN_EPS) * bcast(g2) + bcast(bt2)
    out = jnp.maximum(out, 0.0)
    out = jnp.pad(out, ((0, 0), (0, 0), (PAD2_L, PAD2_R)))
    out = lax.conv_general_dilated(out, w2, window_strides=(1,), padding='VALID',
                                   dimension_numbers=('NCH', 'OIH', 'NCH')) + bcast(b2)

    identity = x
    if DOWNSAMPLE:
        idp = jnp.pad(identity, ((0, 0), (0, 0), (PADM_L, PADM_R)))
        identity = lax.reduce_window(idp, -jnp.inf, lax.max,
                                     window_dimensions=(1, 1, STRIDE),
                                     window_strides=(1, 1, STRIDE), padding='VALID')
    if OUT_CHANNELS != IN_CHANNELS:
        identity = jnp.pad(identity, ((0, 0), (CH1, CH2), (0, 0)))
    return out + identity


if __name__ == "__main__":
    key = jax.random.PRNGKey(0)
    ks = jax.random.split(key, 13)

    x = jax.random.normal(ks[0], (BATCH, IN_CHANNELS, LENGTH), jnp.float32)

    # Deterministic synthetic parameters (shapes from BasicBlock.__init__)
    w1 = jax.random.normal(ks[1], (OUT_CHANNELS, IN_CHANNELS // GROUPS, KERNEL_SIZE),
                           jnp.float32) / math.sqrt(IN_CHANNELS * KERNEL_SIZE)
    b1 = 0.1 * jax.random.normal(ks[2], (OUT_CHANNELS,), jnp.float32)
    g1 = 1.0 + 0.1 * jax.random.normal(ks[3], (IN_CHANNELS,), jnp.float32)
    bt1 = 0.1 * jax.random.normal(ks[4], (IN_CHANNELS,), jnp.float32)
    rm1 = 0.1 * jax.random.normal(ks[5], (IN_CHANNELS,), jnp.float32)
    rv1 = 1.0 + 0.1 * jax.random.uniform(ks[6], (IN_CHANNELS,), jnp.float32)

    w2 = jax.random.normal(ks[7], (OUT_CHANNELS, OUT_CHANNELS // GROUPS, KERNEL_SIZE),
                           jnp.float32) / math.sqrt(OUT_CHANNELS * KERNEL_SIZE)
    b2 = 0.1 * jax.random.normal(ks[8], (OUT_CHANNELS,), jnp.float32)
    g2 = 1.0 + 0.1 * jax.random.normal(ks[9], (OUT_CHANNELS,), jnp.float32)
    bt2 = 0.1 * jax.random.normal(ks[10], (OUT_CHANNELS,), jnp.float32)
    rm2 = 0.1 * jax.random.normal(ks[11], (OUT_CHANNELS,), jnp.float32)
    rv2 = 1.0 + 0.1 * jax.random.uniform(ks[12], (OUT_CHANNELS,), jnp.float32)

    params = (w1, b1, g1, bt1, rm1, rv1, w2, b2, g2, bt2, rm2, rv2)

    out = jax.block_until_ready(basic_block_forward(x, params))
    assert out.shape == (BATCH, OUT_CHANNELS, L1), out.shape

    ref = reference_forward(x, params)
    max_err = float(jnp.max(jnp.abs(out - ref)))
    if not jnp.allclose(out, ref, atol=1e-3, rtol=1e-3):
        raise AssertionError(f"Pallas kernel mismatch vs reference, max abs err = {max_err}")

    print("KERNEL_OK")
</pallas_src>

<mosaic_0001>
module attributes {stable_mosaic.version = 11 : i64} {
  func.func @basic_block_kernel(%arg0: i32, %arg1: memref<12x16xf32, #tpu.memory_space<vmem>>, %arg2: memref<8x12xf32, #tpu.memory_space<vmem>>, %arg3: memref<24x8xf32, #tpu.memory_space<vmem>>, %arg4: memref<2x16x16xf32, #tpu.memory_space<vmem>>, %arg5: memref<12x4xf32, #tpu.memory_space<vmem>>, %arg6: memref<8x16xf32, #tpu.memory_space<vmem>>) attributes {dimension_semantics = [#tpu.dimension_semantics<arbitrary>], iteration_bounds = array<i64: 1>, scalar_prefetch = 0 : i64, scratch_operands = 0 : i64, tpu.core_type = #tpu.core_type<tc>, window_params = [{pipeline_mode = #tpu.pipeline_mode<synchronous>, transform_indices = @transform_0, window_bounds = array<i64: 12, 16>}, {pipeline_mode = #tpu.pipeline_mode<synchronous>, transform_indices = @transform_1, window_bounds = array<i64: 8, 12>}, {pipeline_mode = #tpu.pipeline_mode<synchronous>, transform_indices = @transform_2, window_bounds = array<i64: 24, 8>}, {pipeline_mode = #tpu.pipeline_mode<synchronous>, transform_indices = @transform_3, window_bounds = array<i64: 2, 16, 16>}, {pipeline_mode = #tpu.pipeline_mode<synchronous>, transform_indices = @transform_4, window_bounds = array<i64: 12, 4>}, {pipeline_mode = #tpu.pipeline_mode<synchronous>, transform_indices = @transform_5, window_bounds = array<i64: 8, 16>}]} {
    %c0 = arith.constant 0 : index
    %c0_0 = arith.constant 0 : index
    %0 = vector.load %arg1[%c0, %c0_0] : memref<12x16xf32, #tpu.memory_space<vmem>>, vector<12x16xf32>
    %c0_1 = arith.constant 0 : index
    %c0_2 = arith.constant 0 : index
    %1 = vector.load %arg5[%c0_1, %c0_2] : memref<12x4xf32, #tpu.memory_space<vmem>>, vector<12x1xf32>
    %c0_3 = arith.constant 0 : index
    %c1 = arith.constant 1 : index
    %2 = vector.load %arg5[%c0_3, %c1] : memref<12x4xf32, #tpu.memory_space<vmem>>, vector<12x1xf32>
    %c0_4 = arith.constant 0 : index
    %c2 = arith.constant 2 : index
    %3 = vector.load %arg5[%c0_4, %c2] : memref<12x4xf32, #tpu.memory_space<vmem>>, vector<8x1xf32>
    %c0_5 = arith.constant 0 : index
    %c3 = arith.constant 3 : index
    %4 = vector.load %arg5[%c0_5, %c3] : memref<12x4xf32, #tpu.memory_space<vmem>>, vector<8x1xf32>
    %5 = vector.broadcast %1 : vector<12x1xf32> to vector<12x16xf32>
    %6 = arith.mulf %0, %5 : vector<12x16xf32>
    %7 = vector.broadcast %2 : vector<12x1xf32> to vector<12x16xf32>
    %8 = arith.addf %6, %7 : vector<12x16xf32>
    %cst = arith.constant 0.000000e+00 : f32
    %9 = vector.broadcast %cst : f32 to vector<12x16xf32>
    %10 = arith.maximumf %8, %9 : vector<12x16xf32>
    %11 = tpu.iota {dimensions = array<i32: 0>} : vector<12x16xi32>
    %12 = tpu.iota {dimensions = array<i32: 1>} : vector<12x16xi32>
    %c8_i32 = arith.constant 8 : i32
    %13 = vector.broadcast %c8_i32 : i32 to vector<12x16xi32>
    %14 = arith.cmpi slt, %11, %13 : vector<12x16xi32>
    %c8_i32_6 = arith.constant 8 : i32
    %c0_i32 = arith.constant 0 : i32
    %15 = arith.cmpi eq, %c8_i32_6, %c0_i32 : i32
    %c1_i32 = arith.constant 1 : i32
    %16 = arith.select %15, %c1_i32, %c8_i32_6 : i32
    %17 = vector.broadcast %16 : i32 to vector<12x16xi32>
    %18 = arith.remsi %12, %17 : vector<12x16xi32>
    %c0_i32_7 = arith.constant 0 : i32
    %19 = vector.broadcast %c0_i32_7 : i32 to vector<12x16xi32>
    %20 = arith.cmpi ne, %18, %19 : vector<12x16xi32>
    %c0_i32_8 = arith.constant 0 : i32
    %21 = vector.broadcast %c0_i32_8 : i32 to vector<12x16xi32>
    %22 = arith.cmpi slt, %18, %21 : vector<12x16xi32>
    %c0_i32_9 = arith.constant 0 : i32
    %23 = arith.cmpi slt, %16, %c0_i32_9 : i32
    %24 = vector.broadcast %23 : i1 to vector<12x16xi1>
    %25 = vector.broadcast %24 : vector<12x16xi1> to vector<12x16xi1>
    %26 = arith.xori %22, %25 : vector<12x16xi1>
    %27 = arith.andi %26, %20 : vector<12x16xi1>
    %28 = vector.broadcast %16 : i32 to vector<12x16xi32>
    %29 = arith.addi %18, %28 : vector<12x16xi32>
    %30 = arith.select %27, %29, %18 : vector<12x16xi1>, vector<12x16xi32>
    %c7_i32 = arith.constant 7 : i32
    %31 = vector.broadcast %c7_i32 : i32 to vector<12x16xi32>
    %32 = arith.cmpi ne, %30, %31 : vector<12x16xi32>
    %33 = arith.ori %14, %32 : vector<12x16xi1>
    %cst_10 = arith.constant 0.000000e+00 : f32
    %34 = vector.broadcast %cst_10 : f32 to vector<12x16xf32>
    %35 = arith.select %33, %10, %34 : vector<12x16xi1>, vector<12x16xf32>
    %c0_11 = arith.constant 0 : index
    %c0_12 = arith.constant 0 : index
    %36 = vector.load %arg2[%c0_11, %c0_12] : memref<8x12xf32, #tpu.memory_space<vmem>>, vector<8x12xf32>
    %cst_13 = arith.constant dense<0.000000e+00> : vector<8x16xf32>
    %37 = tpu.matmul %36, %35, %cst_13 {dimension_numbers = #tpu.dot_dimension_numbers<[1], [0], [0], [1], [0, 0, 1, 1], [], []>} : vector<8x12xf32>, vector<12x16xf32>, vector<8x16xf32> -> vector<8x16xf32>
    %38 = vector.broadcast %3 : vector<8x1xf32> to vector<8x16xf32>
    %39 = arith.addf %37, %38 : vector<8x16xf32>
    %cst_14 = arith.constant 0.000000e+00 : f32
    %40 = vector.broadcast %cst_14 : f32 to vector<8x16xf32>
    %41 = arith.maximumf %39, %40 : vector<8x16xf32>
    %c0_15 = arith.constant 0 : index
    %c0_16 = arith.constant 0 : index
    %42 = vector.load %arg3[%c0_15, %c0_16] : memref<24x8xf32, #tpu.memory_space<vmem>>, vector<24x8xf32>
    %cst_17 = arith.constant dense<0.000000e+00> : vector<24x16xf32>
    %43 = tpu.matmul %42, %41, %cst_17 {dimension_numbers = #tpu.dot_dimension_numbers<[1], [0], [0], [1], [0, 0, 1, 1], [], []>} : vector<24x8xf32>, vector<8x16xf32>, vector<24x16xf32> -> vector<24x16xf32>
    %44 = vector.extract_strided_slice %43 {offsets = [0, 0], sizes = [8, 16], strides = [1, 1]} : vector<24x16xf32> to vector<8x16xf32>
    %45 = vector.extract_strided_slice %43 {offsets = [8, 0], sizes = [8, 16], strides = [1, 1]} : vector<24x16xf32> to vector<8x16xf32>
    %46 = vector.extract_strided_slice %43 {offsets = [16, 0], sizes = [8, 16], strides = [1, 1]} : vector<24x16xf32> to vector<8x16xf32>
    %c0_18 = arith.constant 0 : index
    %c0_19 = arith.constant 0 : index
    %c0_20 = arith.constant 0 : index
    %47 = vector.load %arg4[%c0_18, %c0_19, %c0_20] : memref<2x16x16xf32, #tpu.memory_space<vmem>>, vector<1x16x16xf32>
    %48 = vector.shape_cast %47 : vector<1x16x16xf32> to vector<16x16xf32>
    %cst_21 = arith.constant dense<0.000000e+00> : vector<8x16xf32>
    %49 = tpu.matmul %44, %48, %cst_21 {dimension_numbers = #tpu.dot_dimension_numbers<[1], [0], [0], [1], [0, 0, 1, 1], [], []>} : vector<8x16xf32>, vector<16x16xf32>, vector<8x16xf32> -> vector<8x16xf32>
    %50 = arith.addf %49, %45 : vector<8x16xf32>
    %c1_22 = arith.constant 1 : index
    %c0_23 = arith.constant 0 : index
    %c0_24 = arith.constant 0 : index
    %51 = vector.load %arg4[%c1_22, %c0_23, %c0_24] : memref<2x16x16xf32, #tpu.memory_space<vmem>>, vector<1x16x16xf32>
    %52 = vector.shape_cast %51 : vector<1x16x16xf32> to vector<16x16xf32>
    %cst_25 = arith.constant dense<0.000000e+00> : vector<8x16xf32>
    %53 = tpu.matmul %46, %52, %cst_25 {dimension_numbers = #tpu.dot_dimension_numbers<[1], [0], [0], [1], [0, 0, 1, 1], [], []>} : vector<8x16xf32>, vector<16x16xf32>, vector<8x16xf32> -> vector<8x16xf32>
    %54 = arith.addf %50, %53 : vector<8x16xf32>
    %55 = vector.broadcast %4 : vector<8x1xf32> to vector<8x16xf32>
    %56 = arith.addf %54, %55 : vector<8x16xf32>
    %c0_26 = arith.constant 0 : index
    %c0_27 = arith.constant 0 : index
    %57 = vector.load %arg1[%c0_26, %c0_27] : memref<12x16xf32, #tpu.memory_space<vmem>>, vector<4x16xf32>
    %c4 = arith.constant 4 : index
    %c0_28 = arith.constant 0 : index
    %58 = vector.load %arg1[%c4, %c0_28] : memref<12x16xf32, #tpu.memory_space<vmem>>, vector<4x16xf32>
    %59 = arith.maximumf %57, %58 : vector<4x16xf32>
    %cst_29 = arith.constant 0.000000e+00 : f32
    %60 = vector.broadcast %cst_29 : f32 to vector<2x16xf32>
    %cst_30 = arith.constant 0.000000e+00 : f32
    %61 = vector.broadcast %cst_30 : f32 to vector<2x16xf32>
    %62 = tpu.concatenate %60, %59, %61 in 0 : vector<2x16xf32>, vector<4x16xf32>, vector<2x16xf32> -> vector<8x16xf32>
    %63 = arith.addf %56, %62 : vector<8x16xf32>
    %c0_31 = arith.constant 0 : index
    %c0_32 = arith.constant 0 : index
    %64 = vector.load %arg6[%c0_31, %c0_32] : memref<8x16xf32, #tpu.memory_space<vmem>>, vector<8x16xf32>
    tpu.vector_store %arg6[%c0_31, %c0_32], %63 {strides = array<i32>} : memref<8x16xf32, #tpu.memory_space<vmem>>, vector<8x16xf32>,
    return
  }
  func.func @transform_0(%arg0: i32) -> (i32, i32) {
    %c0_i32 = arith.constant 0 : i32
    %c0_i32_0 = arith.constant 0 : i32
    %c0_i32_1 = arith.constant 0 : i32
    return %c0_i32, %c0_i32_0 : i32, i32
  }
  func.func @transform_1(%arg0: i32) -> (i32, i32) {
    %c0_i32 = arith.constant 0 : i32
    %c0_i32_0 = arith.constant 0 : i32
    %c0_i32_1 = arith.constant 0 : i32
    return %c0_i32, %c0_i32_0 : i32, i32
  }
  func.func @transform_2(%arg0: i32) -> (i32, i32) {
    %c0_i32 = arith.constant 0 : i32
    %c0_i32_0 = arith.constant 0 : i32
    %c0_i32_1 = arith.constant 0 : i32
    return %c0_i32, %c0_i32_0 : i32, i32
  }
  func.func @transform_3(%arg0: i32) -> (i32, i32, i32) {
    %c0_i32 = arith.constant 0 : i32
    %c0_i32_0 = arith.constant 0 : i32
    %c0_i32_1 = arith.constant 0 : i32
    %c0_i32_2 = arith.constant 0 : i32
    return %c0_i32, %c0_i32_0, %c0_i32_1 : i32, i32, i32
  }
  func.func @transform_4(%arg0: i32) -> (i32, i32) {
    %c0_i32 = arith.constant 0 : i32
    %c0_i32_0 = arith.constant 0 : i32
    %c0_i32_1 = arith.constant 0 : i32
    return %c0_i32, %c0_i32_0 : i32, i32
  }
  func.func @transform_5(%arg0: i32) -> (i32, i32) {
    %c0_i32 = arith.constant 0 : i32
    %c0_i32_0 = arith.constant 0 : i32
    %c0_i32_1 = arith.constant 0 : i32
    return %c0_i32, %c0_i32_0 : i32, i32
  }
}

</mosaic_0001>

<bundles_post_ra>
// kernel: tpu_custom_call.1
= control target key start
LH: loop header
LB: loop body
LE: loop exit
PB: predicated region body
PF: predicated region fallthrough
CT: control target
= control target key end

     0   :  { %v536_v1 = vmov 1   ;;  %v537_v2 = vmov 0   ;;  %s645_s0 = inlined_call_operand.vmem [shape: f32[12,16], index: 0, kind: input, shape index: {}]   ;;  %s646_s1 = inlined_call_operand.vmem [shape: f32[8,12], index: 1, kind: input, shape index: {}]   ;;  %s647_s2 = inlined_call_operand.vmem [shape: f32[24,8], index: 2, kind: input, shape index: {}]   ;;  %s648_s3 = inlined_call_operand.vmem [shape: f32[2,16,16], index: 3, kind: input, shape index: {}]   ;;  %s649_s4 = inlined_call_operand.vmem [shape: f32[12,4], index: 4, kind: input, shape index: {}]   ;;  %s650_s5 = inlined_call_operand.hbm [shape: f32[8,16], index: 5, kind: output, shape index: {}]  }
   0x1   :  { %v24_v0 = vld [vmem:[%s649_s4 + $0x8] sm:$0xf]  ;;  %508 = vset.pattern.permute.xlu1 %v536_v1  ;;  %507 = vset.pattern.permute.xlu0 %v537_v2 }
   0x2   :  { %10 = vsyncpa [#allocation3], 0  ;;  %42 = vperm.xlu1 %508, %v24_v0   ;;  %32 = vperm.xlu0 %507, %v24_v0   ;;  %v23_v3 = vld [vmem:[%s649_s4] sm:$0xff]  ;;  %v538_v4 = vmov 0.0|0.0   ;;  %vm539_vm0 = vmmov 0   ;;  %v540_v5 = vmov 0.0   ;;  %v52_v7 = vlaneseq }
   0x3   :  { %488 = vmatprep.subr.bf16.mxu0 %v538_v4  ;;  %460 = vmatprep.mubr.msk.f32.mxu0 %vm539_vm0, %v540_v5  ;;  %v541_v6 = vmov 2   ;;  %v22_v8 = vld [vmem:[%s645_s0 + $0x8] sm:$0xf]  ;;  %v21_v13 = vld [vmem:[%s645_s0] sm:$0xff]  ;;  %vm82_vm2 = vcmask 1043456   ;;  %vm542_vm3 = vmmov 1  }
   0x4   :  { %463 = vmatprep.subr.mxu1 %v540_v5  ;;  %465 = vmatprep.mubr.msk.f32.mxu1 %vm539_vm0, %v540_v5  ;;  %v53_v9 = vand.u32 127, %v52_v7  ;;  %vm490_vm4 = vmpackc.low %vm82_vm2, %vm542_vm3  ;;  %v73_v24 = vld [vmem:[%s646_s1] sm:$0xff]  ;;  %vm78_vm5 = vcmask 97280   ;;  %v251_v26 = vld [vmem:[%s648_s3 + $0x8] sm:$0xff]  ;;  %vm160_vm6 = vcmask 64512   ;;  %v543_v36 = vmov 3  }
   0x5   :  { %v250_v25 = vld [vmem:[%s648_s3] sm:$0xff]  ;;  %v158_v34 = vld [vmem:[%s647_s2 + $0x8] sm:$0xff]  ;;  %v159_v35 = vld [vmem:[%s647_s2 + $0x10] sm:$0xff]  ;;  %vm252_vm7 = vcmask 130048   ;;  %vm414_vm8 = vcmask 1041408   ;;  %vm416_vm9 = vcmask 1045504  }
   0x6   :  { %38 = vperm.xlu1 %508, %v23_v3   ;;  %27 = vperm.xlu0 %507, %v23_v3   ;;  %v60_v15 = vand.u32 7, %v53_v9  ;;  %v493_v27 = vpack.c.bf16 %v251_v26, %v250_v25  ;;  %v157_v33 = vld [vmem:[%s647_s2] sm:$0xff]  ;;  %v440_v37 = vld [vmem:[%s648_s3 + $0x10] sm:$0xff]  ;;  %v441_v38 = vld [vmem:[%s648_s3 + $0x18] sm:$0xff]  ;;  %s544_s17 = smov [#allocation2]  }
   0x7   :  { %v496_v39 = vpack.c.bf16 %v441_v38, %v440_v37  ;;  %v408_v46 = vld [vmem:[%s645_s0] sm:$0xf]  ;;  %v409_v47 = vld [vmem:[%s645_s0 + $0x4] sm:$0xf]  ;;  %s426_s18 = sshll.u32 %s544_s17, 4  ;;  %s427_s18 = int_to_ptr.vmem [resolvable:$true] %s426_s18 }
   0x8   :  { %vm68_vm1 = vcmp.ne.s32.totalorder %v60_v15, 7  ;;  %v410_v48 = vmax.f32 %v408_v46, %v409_v47  ;;  %s512_s0 = scalar_lea.vmem %s427_s18, 128  ;;  %p517_p1 = scmp.lt.s32.totalorder %s427_s18, %s427_s18 }
   0x9   :  { %p513_p0 = scmp.ne.s32.totalorder %s427_s18, %s512_s0  ;;  %p518_p2 = scmp.lt.s32.totalorder %s512_s0, %s512_s0 }
   0xa   :  { %509 = vset.pattern.permute.xlu0 %v541_v6  ;;  %510 = vset.pattern.permute.xlu1 %v543_v36  ;;  %v412_v52 = vrot.slane %v410_v48, 6 }
   0xb   :  { %75 = vperm.xlu0 %509, %v23_v3   ;;  %404 = vperm.xlu1 %510, %v23_v3   ;;  %p519_p3 = por %p518_p2, %p517_p1 }
   0xc   :  { %v415_v53 = vsel %vm414_vm8, 0.0, %v412_v52 }
   0xd   :  { %v417_v58 = vsel %vm416_vm9, %v415_v53, 0.0  ;;  %p520_p4 = pnand %p519_p3, %p513_p0 }
   0xf   :  { %511 = vset.pattern.permute.xlu0 %v543_v36 }
  0x81   :  { %v43_v10 = vpop.permute.xlu1 %42  ;;  %v33_v11 = vpop.permute.xlu0 %32 }
  0x82   :  { %v36_v12 = vmul.f32 %v33_v11, %v22_v8 }
  0x84   :  { %v46_v14 = vadd.f32 %v43_v10, %v36_v12 }
  0x85   :  { %v28_v16 = vpop.permute.xlu0 %27  ;;  %v39_v19 = vpop.permute.xlu1 %38 }
  0x86   :  { %v35_v17 = vmul.f32 %v28_v16, %v21_v13  ;;  %v48_v18 = vmax.f32 %v46_v14, 0.0 }
  0x88   :  { %v45_v20 = vadd.f32 %v39_v19, %v35_v17  ;;  %v72_v22 = vsel %vm68_vm1, %v48_v18, 0.0 }
  0x8a   :  { %v47_v21 = vmax.f32 %v45_v20, 0.0  ;;  %v76_v28 = vpop.permute.xlu0 %75  ;;  %v405_v55 = vpop.permute.xlu1 %404 }
  0x8c   :  { %v489_v23 = vpack.c.bf16 %v72_v22, %v47_v21 }
  0x8e   :  { %491 = vmatpush3.bf16.msk.msra.mxu0 %vm490_vm4, %v489_v23 }
  0x8f   :  { %492 = vmatprep.subr.bf16.mxu0 %v538_v4 }
  0x91   :  { %461 = vmatmul.mubr.msk.f32.vlgmr.msra.gmra.mrb[0].mxu0 %vm78_vm5, %v73_v24 }
  0x92   :  { %478 = vmatprep.mubr.msk.f32.mxu0 %vm539_vm0, %v540_v5  ;;  %494 = vmatpush3.bf16.msra.mxu0 %v493_v27 }
  0x93   :  { %495 = vmatprep.subr.bf16.mxu0 %v538_v4 }
 0x164   :  { %v152_v29 = vpop.f32.mrb[0].mxu0 }
 0x165   :  { %v153_v30 = vadd.f32 %v152_v29, %v76_v28  ;;  %v462_v31 = vpop.f32.mrb[1].mxu0 }
 0x167   :  { %v156_v32 = vmax.f32 %v153_v30, 0.0 }
 0x169   :  { %464 = vmatpush3.msra.mxu1 %v156_v32 }
 0x16a   :  { %466 = vmatmul.mubr.msk.f32.vlgmr.msra.gmra.mrb[0].mxu1 %vm160_vm6, %v157_v33 }
 0x16b   :  { %468 = vmatprep.mubr.msk.f32.mxu1 %vm539_vm0, %v540_v5 }
 0x16e   :  { %469 = vmatmul.mubr.msk.f32.gmra.mrb[2].mxu1 %vm160_vm6, %v158_v34 }
 0x16f   :  { %471 = vmatprep.mubr.msk.f32.mxu1 %vm539_vm0, %v540_v5 }
 0x172   :  { %472 = vmatmul.mubr.msk.f32.gmra.mrb[4].mxu1 %vm160_vm6, %v159_v35 }
 0x23d   :  { %v236_v40 = vpop.f32.mrb[0].mxu1 }
 0x23e   :  { %v467_v41 = vpop.f32.mrb[1].mxu1  ;;  %479 = vmatmul.mubr.msk.f32.vlgmr.msra.gmra.mrb[2].mxu0 %vm252_vm7, %v236_v40 }
 0x23f   :  { %497 = vmatpush3.bf16.msra.mxu0 %v496_v39  ;;  %485 = vmatprep.mubr.msk.f32.mxu0 %vm539_vm0, %v540_v5 }
 0x241   :  { %v241_v42 = vpop.f32.mrb[2].mxu1 }
 0x242   :  { %v470_v43 = vpop.f32.mrb[3].mxu1 }
 0x245   :  { %v246_v44 = vpop.f32.mrb[4].mxu1 }
 0x246   :  { %v473_v45 = vpop.f32.mrb[5].mxu1  ;;  %486 = vmatmul.mubr.msk.f32.vlgmr.msra.gmra.mrb[4].mxu0 %vm252_vm7, %v246_v44 }
 0x311   :  { %v322_v49 = vpop.f32.mrb[2].mxu0 }
 0x312   :  { %v323_v50 = vadd.f32 %v322_v49, %v241_v42  ;;  %v480_v51 = vpop.f32.mrb[3].mxu0 }
 0x319   :  { %v398_v54 = vpop.f32.mrb[4].mxu0 }
 0x31a   :  { %v402_v56 = vadd.f32 %v398_v54, %v323_v50  ;;  %v487_v57 = vpop.f32.mrb[5].mxu0 }
 0x31c   :  { %v407_v59 = vadd.f32 %v405_v55, %v402_v56 }
 0x31e   :  { %v418_v60 = vadd.f32 %v417_v58, %v407_v59 }
 0x320   :  { %419 = vst.msk [vmem:[#allocation2] sm:$0xff] %vm252_vm7, %v418_v60 }
 0x321   :  { %523 = shalt.err (!%p520_p4)
}
 0x322   :  { %s524_s21 = scalar_lea.hbm %s650_s5, 128 }
 0x323   :  { %p525_p5 = scmp.ne.s32.totalorder %s650_s5, %s524_s21  ;;  %p528_p6 = scmp.lt.u32.totalorder %s524_s21, %s650_s5 }
 0x325   :  { %p530_p7 = pnand %p528_p6, %p525_p5 }
 0x327   :  { %533 = shalt.err (!%p530_p7)
}
 0x328   :  { %429 = dma.vmem_to_hbm [thread:$0]  %s427_s18, 128, %s650_s5, [#allocation3]  }
 0x329   :  { %534 = dma.done.wait [#allocation3], 128  }
 0x32a   :  { %535 = vsyncadd [#allocation3], 4294967168 }
 0x32b   :  { %433 = vsyncpa [#allocation3], 1 }

</bundles_post_ra>
